<compile_context>
chip_gen: v5e
topology: v5e:2x2
jax: 0.10.0
libtpu: 0.0.40
codegen_flags: <defaults>
</compile_context>

<pallas_src>
import functools
import math

import numpy as np
import jax
import jax.numpy as jnp
from jax.experimental import pallas as pl
from jax.experimental.pallas import tpu as pltpu

_SQRT2 = math.sqrt(2.0)

_TARGET_BLOCK_BYTES = 8 * 1024 * 1024   # ~8 MiB per grid step
_MIN_STRIP_BYTES = 1 * 1024 * 1024      # never shrink strips below ~1 MiB
_VMEM_CAP_BYTES = 48 * 1024 * 1024      # headroom under v7x's 64 MiB physical VMEM


# ---------------------------------------------------------------------------
# Kernel body: elementwise scaled leaky-relu on one (row_block, lane) tile.
# ---------------------------------------------------------------------------
def _scaled_leaky_relu_kernel(x_ref, o_ref, *, pos_scale, neg_scale):
    x = x_ref[...]                                    # compute in native dtype
    y = jnp.where(x >= 0, x * pos_scale, x * neg_scale)
    o_ref[...] = y.astype(o_ref.dtype)


def _round_up(a, b):
    return (a + b - 1) // b * b


def _sublane_multiple(itemsize):
    # f32 -> 8, bf16/f16 -> 16, int8/fp8 -> 32 (packed-sublane min tiles).
    return max(8, 32 // int(itemsize))


def _pick_lane(total, sub):
    """Largest lane (multiple of 128) dividing `total`; prefer n_rows % sub == 0."""
    best = None
    for lane in (2048, 1024, 512, 256, 128):
        if total % lane == 0:
            if (total // lane) % sub == 0:
                return lane, True
            if best is None:
                best = lane
    if best is not None:
        return best, True
    return 128, False                                  # pad path


def _pick_row_block(n_rows, lane, itemsize, sub):
    row_bytes = lane * itemsize
    target_rows = max(sub, (_TARGET_BLOCK_BYTES // row_bytes) // sub * sub)
    min_strip_rows = max(sub, (_MIN_STRIP_BYTES // row_bytes) // sub * sub)

    if n_rows <= sub:
        return n_rows                                  # single full-extent block

    rb = min(target_rows, (n_rows // sub) * sub)
    if rb >= n_rows:
        # Everything fits one block: split into an even number of strips for
        # the v7x megacore, but only if each strip stays >= ~1 MiB.
        for parts in (4, 2):
            if n_rows % (parts * sub) == 0 and n_rows // parts >= min_strip_rows:
                return n_rows // parts
        return rb

    grid = pl.cdiv(n_rows, rb)
    if grid % 2 == 1:
        # Prefer an even grid (2 TCs on v7x) without creating tiny strips.
        rb_alt = _round_up(pl.cdiv(n_rows, grid + 1), sub)
        if rb_alt >= min_strip_rows:
            rb = rb_alt
    return rb


# ---------------------------------------------------------------------------
# Wrapper: flatten -> lane-dense 2D -> pallas_call over row strips -> reshape.
# ---------------------------------------------------------------------------
def scaled_leaky_relu_pallas(x, negative_slope=0.2):
    orig_shape = x.shape
    dtype = x.dtype
    itemsize = int(jnp.dtype(dtype).itemsize)
    total = int(np.prod(orig_shape)) if orig_shape else 1
    sub = _sublane_multiple(itemsize)

    lane, divides = _pick_lane(total, sub)

    flat = jnp.ravel(x)
    if divides:
        n_rows = total // lane
        padded = total
    else:
        # Uncommon path (total not a multiple of 128): pad to a full tile grid.
        n_rows = _round_up(max(pl.cdiv(total, lane), 1), sub)
        padded = n_rows * lane
        flat = jnp.pad(flat, (0, padded - total))

    x2d = flat.reshape(n_rows, lane)

    row_block = _pick_row_block(n_rows, lane, itemsize, sub)
    grid = pl.cdiv(n_rows, row_block)
    block_bytes = row_block * lane * itemsize
    vmem_limit = int(min(_VMEM_CAP_BYTES,
                         max(16 * 1024 * 1024, 4 * block_bytes + 8 * 1024 * 1024)))

    kern = functools.partial(
        _scaled_leaky_relu_kernel,
        pos_scale=float(_SQRT2),
        neg_scale=float(negative_slope * _SQRT2),
    )

    out2d = pl.pallas_call(
        kern,
        out_shape=jax.ShapeDtypeStruct((n_rows, lane), dtype),
        grid=(grid,),
        in_specs=[pl.BlockSpec((row_block, lane), lambda i: (i, 0))],
        out_specs=pl.BlockSpec((row_block, lane), lambda i: (i, 0)),
        compiler_params=pltpu.CompilerParams(
            dimension_semantics=("parallel",),
            vmem_limit_bytes=vmem_limit,
        ),
        cost_estimate=pl.CostEstimate(
            flops=padded,                      # compare+select+mul ~ 1/elt
            transcendentals=0,
            bytes_accessed=2 * padded * itemsize,
        ),
    )(x2d)

    if divides:
        return out2d.reshape(orig_shape)
    return out2d.reshape(-1)[:total].reshape(orig_shape)


# ---------------------------------------------------------------------------
# Pure-JAX reference for the correctness check.
# ---------------------------------------------------------------------------
def scaled_leaky_relu_reference(x, negative_slope=0.2):
    xf = x.astype(jnp.float32)
    y = jnp.where(xf >= 0, xf, xf * negative_slope) * np.float32(_SQRT2)
    return y.astype(x.dtype)


if __name__ == "__main__":
    key = jax.random.PRNGKey(0)
    x = jax.random.normal(key, (2, 4, 16, 16), dtype=jnp.float32)  # NCHW

    out = jax.block_until_ready(scaled_leaky_relu_pallas(x, negative_slope=0.2))
    ref = scaled_leaky_relu_reference(x, negative_slope=0.2)
    np.testing.assert_allclose(np.asarray(out), np.asarray(ref),
                               rtol=1e-6, atol=1e-6)
    assert out.shape == x.shape and out.dtype == x.dtype

    # Ragged / non-multiple-of-128 fallback path.
    x_odd = jax.random.normal(jax.random.PRNGKey(1), (3, 5, 7), dtype=jnp.float32)
    out_odd = jax.block_until_ready(scaled_leaky_relu_pallas(x_odd, 0.2))
    np.testing.assert_allclose(np.asarray(out_odd),
                               np.asarray(scaled_leaky_relu_reference(x_odd, 0.2)),
                               rtol=1e-6, atol=1e-6)

    # bf16 path (native bf16 compute in-kernel; slightly different rounding).
    x_bf = jax.random.normal(jax.random.PRNGKey(2), (2, 4, 16, 16), dtype=jnp.bfloat16)
    out_bf = jax.block_until_ready(scaled_leaky_relu_pallas(x_bf, 0.2))
    ref_bf = scaled_leaky_relu_reference(x_bf, 0.2)
    np.testing.assert_allclose(np.asarray(out_bf.astype(jnp.float32)),
                               np.asarray(ref_bf.astype(jnp.float32)),
                               rtol=1e-2, atol=1e-2)

    print("KERNEL_OK")
</pallas_src>

<mosaic_0001>
module attributes {stable_mosaic.version = 11 : i64} {
  func.func @_scaled_leaky_relu_kernel(%arg0: i32, %arg1: memref<8x256xf32, #tpu.memory_space<vmem>>, %arg2: memref<8x256xf32, #tpu.memory_space<vmem>>) attributes {dimension_semantics = [#tpu.dimension_semantics<parallel>], iteration_bounds = array<i64: 1>, scalar_prefetch = 0 : i64, scratch_operands = 0 : i64, tpu.core_type = #tpu.core_type<tc>, window_params = [{transform_indices = @transform_0, window_bounds = array<i64: 8, 256>}, {transform_indices = @transform_1, window_bounds = array<i64: 8, 256>}]} {
    %c0 = arith.constant 0 : index
    %c0_0 = arith.constant 0 : index
    %0 = vector.load %arg1[%c0, %c0_0] : memref<8x256xf32, #tpu.memory_space<vmem>>, vector<8x256xf32>
    %cst = arith.constant 0.000000e+00 : f32
    %1 = vector.broadcast %cst : f32 to vector<8x256xf32>
    %2 = arith.cmpf oge, %0, %1 : vector<8x256xf32>
    %cst_1 = arith.constant 1.41421354 : f32
    %3 = vector.broadcast %cst_1 : f32 to vector<8x256xf32>
    %4 = arith.mulf %0, %3 : vector<8x256xf32>
    %cst_2 = arith.constant 0.282842726 : f32
    %5 = vector.broadcast %cst_2 : f32 to vector<8x256xf32>
    %6 = arith.mulf %0, %5 : vector<8x256xf32>
    %7 = arith.select %2, %4, %6 : vector<8x256xi1>, vector<8x256xf32>
    %c0_3 = arith.constant 0 : index
    %c0_4 = arith.constant 0 : index
    %8 = vector.load %arg2[%c0_3, %c0_4] : memref<8x256xf32, #tpu.memory_space<vmem>>, vector<8x256xf32>
    tpu.vector_store %arg2[%c0_3, %c0_4], %7 {strides = array<i32>} : memref<8x256xf32, #tpu.memory_space<vmem>>, vector<8x256xf32>,
    return
  }
  func.func @transform_0(%arg0: i32) -> (i32, i32) {
    %c0_i32 = arith.constant 0 : i32
    %c0_i32_0 = arith.constant 0 : i32
    return %arg0, %c0_i32 : i32, i32
  }
  func.func @transform_1(%arg0: i32) -> (i32, i32) {
    %c0_i32 = arith.constant 0 : i32
    %c0_i32_0 = arith.constant 0 : i32
    return %arg0, %c0_i32 : i32, i32
  }
}

</mosaic_0001>

<bundles_post_ra>
// kernel: tpu_custom_call.1
= control target key start
LH: loop header
LB: loop body
LE: loop exit
PB: predicated region body
PF: predicated region fallthrough
CT: control target
= control target key end

     0   :  { %6 = vsyncpa [#allocation3], 0  ;;  %s124_s0 = inlined_call_operand.hbm [shape: f32[8,256], index: 0, kind: input, shape index: {}]   ;;  %s125_s1 = inlined_call_operand.hbm [shape: f32[8,256], index: 1, kind: output, shape index: {}]  }
   0x1   :  { %7 = vsyncpa [#allocation4], 0  ;;  %s13_s8 = sshll.u32 %s124_s0, 4  ;;  %s106_s9 = smov [#allocation2]   ;;  %s14_s8 = int_to_ptr.hbm [resolvable:$true] %s13_s8 }
   0x2   :  { %s15_s10 = sshll.u32 %s106_s9, 4  ;;  %s16_s10 = int_to_ptr.vmem [resolvable:$true] %s15_s10 }
   0x3   :  { %18 = dma.hbm_to_vmem [thread:$0]  %s14_s8, 256, %s16_s10, [#allocation3]  }
   0x4   :  { %102 = dma.done.wait [#allocation3], 256  }
   0x5   :  { %103 = vsyncadd [#allocation3], 4294967040  ;;  %v23_v0 = vld [vmem:[#allocation2] sm:$0xff]  ;;  %v24_v1 = vld [vmem:[#allocation2 + $0x8] sm:$0xff]  ;;  %s107_s11 = smov [#allocation5]   ;;  %s42_s15 = sshll.u32 %s125_s1, 4  ;;  %s43_s15 = int_to_ptr.hbm [resolvable:$true] %s42_s15 }
   0x6   :  { %s40_s12 = sshll.u32 %s107_s11, 4  ;;  %vm25_vm0 = vcmp.ge.f32.partialorder %v23_v0, 0.0  ;;  %v27_v2 = vmul.f32 1.4142135, %v23_v0  ;;  %v29_v3 = vmul.f32 0.28284273, %v23_v0  ;;  %s41_s12 = int_to_ptr.vmem [resolvable:$true] %s40_s12 }
   0x7   :  { %vm26_vm1 = vcmp.ge.f32.partialorder %v24_v1, 0.0  ;;  %v28_v4 = vmul.f32 1.4142135, %v24_v1  ;;  %v30_v5 = vmul.f32 0.28284273, %v24_v1 }
   0x8   :  { %v31_v6 = vsel %vm25_vm0, %v27_v2, %v29_v3 }
   0x9   :  { %33 = vst [vmem:[#allocation5] sm:$0xff] %v31_v6  ;;  %v32_v7 = vsel %vm26_vm1, %v28_v4, %v30_v5 }
   0xa   :  { %34 = vst [vmem:[#allocation5 + $0x8] sm:$0xff] %v32_v7 }
   0xb   :  { %45 = dma.vmem_to_hbm [thread:$0]  %s41_s12, 256, %s43_s15, [#allocation4]  }
   0xc   :  { %104 = dma.done.wait [#allocation4], 256  }
   0xd   :  { %105 = vsyncadd [#allocation4], 4294967040 }
   0xe   :  { %50 = vsyncpa [#allocation3], 1 }
   0xf   :  { %51 = vsyncpa [#allocation4], 1 }

</bundles_post_ra>
